<compile_context>
chip_gen: v6e
topology: v6e:2x2x1
jax: 0.10.0
libtpu: 0.0.40
codegen_flags: <defaults>
</compile_context>

<pallas_src>
import functools

import jax
import jax.numpy as jnp
from jax.experimental import pallas as pl
from jax.experimental.pallas import tpu as pltpu


def _round_up(x, m):
    return ((x + m - 1) // m) * m


# ----------------------------------------------------------------------------
# Pallas kernel: fused im2col + matmul + bias, lane-dense output.
#   x_ref : (B_TILE, C, LP)     bf16  flattened zero-padded input per channel
#   w_ref : (kh*kw, OC, C)      bf16  gathered conv filters, one (OC, C)
#                                     pointwise matrix per kernel tap
#   b_ref : (OC, 1)             f32   gathered bias
#   o_ref : (B_TILE, OC, LOUT)  bf16  conv output on the padded-width grid;
#                                     LOUT is a multiple of 128 (no vst.msk)
# ----------------------------------------------------------------------------
def _kmeans_conv_kernel(x_ref, w_ref, b_ref, o_ref, *, offsets, lout):
    bias = b_ref[...]                                    # (OC, 1) f32
    for bi in range(x_ref.shape[0]):                     # static batch-tile unroll
        xb = x_ref[bi]                                   # (C, LP) bf16, one load
        acc = None
        for t, off in enumerate(offsets):                # kh*kw static taps
            # Static (possibly unaligned) lane slice = the shifted input
            # window for tap t.  This *is* the im2col, done for free in VMEM.
            win = xb[:, off:off + lout]                  # (C, LOUT) bf16
            part = jnp.dot(w_ref[t], win,
                           preferred_element_type=jnp.float32)  # (OC, LOUT) f32
            acc = part if acc is None else acc + part
        o_ref[bi] = (acc + bias).astype(o_ref.dtype)     # bias on f32 acc


@functools.partial(jax.jit,
                   static_argnames=("stride", "padding", "dilation", "out_dtype"))
def kmeans_conv_forward(x, weight, bias, idx, *, stride, padding, dilation,
                        out_dtype=jnp.bfloat16):
    """
    x      : (N, C_in, H, W)        float32, NCHW (PyTorch convention)
    weight : (ks, C_in, KH, KW)     conv filters
    bias   : (ks,) or None          conv bias
    idx    : (out_channels,) int32  channel gather indices in [0, ks)
    returns: (N, out_channels, H_out, W_out) in out_dtype
    """
    n, c_in, h, w = x.shape
    ks, _, kh, kw = weight.shape
    oc = idx.shape[0]

    eff_kh = (kh - 1) * dilation + 1
    eff_kw = (kw - 1) * dilation + 1
    hp, wp = h + 2 * padding, w + 2 * padding
    ho = (hp - eff_kh) // stride + 1
    wo = (wp - eff_kw) // stride + 1

    # ---- fold the channel index_select into the weights / bias (exact gather)
    w_sel = weight[idx]                                        # (OC, C, kh, kw)
    w_k = jnp.transpose(w_sel, (2, 3, 0, 1)).reshape(kh * kw, oc, c_in)
    w_k = w_k.astype(jnp.bfloat16)
    if bias is None:
        b_sel = jnp.zeros((oc, 1), jnp.float32)
    else:
        b_sel = bias[idx].reshape(oc, 1).astype(jnp.float32)

    # ---- flatten the zero-padded input per channel (bf16: half HBM traffic)
    xb = x.astype(jnp.bfloat16)
    xp = jnp.pad(xb, ((0, 0), (0, 0), (padding, padding), (padding, padding)))

    # Output is computed on the padded-WIDTH grid q = h*Wp + w so every kernel
    # tap is a contiguous shifted slice of the flattened input.  Columns with
    # w >= Wo and q >= lout are garbage and sliced off below.
    h_full = (ho - 1) * stride + 1          # stride-1 rows needed
    lout = h_full * wp
    lout_pad = _round_up(lout, 128)         # lane-dense output stores
    max_off = (kh - 1) * dilation * wp + (kw - 1) * dilation
    lp = _round_up(max(hp * wp, max_off + lout_pad), 128)

    xflat = xp.reshape(n, c_in, hp * wp)
    xflat = jnp.pad(xflat, ((0, 0), (0, 0), (0, lp - hp * wp)))

    # ---- batch tiling: amortize per-step overhead under a VMEM budget while
    #      keeping >= 2 "parallel" grid steps (v7x megacore) whenever N >= 2.
    out_bytes = jnp.dtype(out_dtype).itemsize
    per_img = 2 * (c_in * lp * 2) + 2 * (oc * lout_pad * out_bytes)  # dbl-buffered
    b_tile = max(1, min(n, (8 * 1024 * 1024) // max(per_img, 1)))
    if n >= 2:
        b_tile = min(b_tile, (n + 1) // 2)
    n_pad = _round_up(n, b_tile)
    if n_pad != n:
        xflat = jnp.pad(xflat, ((0, n_pad - n), (0, 0), (0, 0)))

    grid = (n_pad // b_tile,)
    offsets = tuple(i * dilation * wp + j * dilation
                    for i in range(kh) for j in range(kw))

    kernel = functools.partial(_kmeans_conv_kernel,
                               offsets=offsets, lout=lout_pad)

    flops = 2 * n_pad * oc * (kh * kw * c_in) * lout_pad
    bytes_accessed = (n_pad * c_in * lp * 2 + kh * kw * oc * c_in * 2 + oc * 4
                      + n_pad * oc * lout_pad * out_bytes)

    out = pl.pallas_call(
        kernel,
        out_shape=jax.ShapeDtypeStruct((n_pad, oc, lout_pad), out_dtype),
        grid=grid,
        in_specs=[
            pl.BlockSpec((b_tile, c_in, lp), lambda g: (g, 0, 0)),   # input tile
            # Weights / bias are resident (constant index_map).  They are tiny
            # (kh*kw*OC*C bf16 ~ 0.6 KiB), so default double-buffering is
            # negligible.  TODO(synk): pl.Buffered(1) for large-K configs on
            # v7x's 64 MiB VMEM.
            pl.BlockSpec((kh * kw, oc, c_in), lambda g: (0, 0, 0)),  # weights
            pl.BlockSpec((oc, 1), lambda g: (0, 0)),                 # bias
        ],
        out_specs=pl.BlockSpec((b_tile, oc, lout_pad), lambda g: (g, 0, 0)),
        compiler_params=pltpu.CompilerParams(
            dimension_semantics=("parallel",),
            vmem_limit_bytes=32 * 1024 * 1024),
        cost_estimate=pl.CostEstimate(flops=flops, transcendentals=0,
                                      bytes_accessed=bytes_accessed),
    )(xflat, w_k, b_sel)

    # (N, OC, LOUT) on the padded-width grid -> NCHW conv output (no transpose).
    y = out[:n, :, :lout].reshape(n, oc, h_full, wp)
    if stride > 1:
        y = y[:, :, ::stride, ::stride]
    return y[:, :, :ho, :wo]


def _reference(x, weight, bias, idx, *, stride, padding, dilation):
    y = jax.lax.conv_general_dilated(
        x, weight,
        window_strides=(stride, stride),
        padding=((padding, padding), (padding, padding)),
        rhs_dilation=(dilation, dilation),
        dimension_numbers=("NCHW", "OIHW", "NCHW"),
    ) + bias[None, :, None, None]
    return jnp.take(y, idx, axis=1)


if __name__ == "__main__":
    # Module config: KmeansConv(in_channels=4, out_channels=8, kernel_size=3,
    #                           stride=1, padding=1, dilation=1, groups=1,
    #                           bias=True, ks=6)
    N, C_IN, H, W = 2, 4, 16, 16
    OUT_CHANNELS, KS, KSIZE = 8, 6, 3
    STRIDE, PADDING, DILATION = 1, 1, 1

    key = jax.random.PRNGKey(0)
    kx, kw_, kb, ki = jax.random.split(key, 4)

    x = jax.random.normal(kx, (N, C_IN, H, W), dtype=jnp.float32)
    weight = jax.random.normal(kw_, (KS, C_IN, KSIZE, KSIZE), dtype=jnp.float32) * 0.1
    bias = jax.random.normal(kb, (KS,), dtype=jnp.float32) * 0.1
    idx = jax.random.randint(ki, (OUT_CHANNELS,), 0, KS, dtype=jnp.int32)

    out = kmeans_conv_forward(x, weight, bias, idx,
                              stride=STRIDE, padding=PADDING, dilation=DILATION)
    out = jax.block_until_ready(out)

    ref = _reference(x, weight, bias, idx,
                     stride=STRIDE, padding=PADDING, dilation=DILATION)
    assert out.shape == (N, OUT_CHANNELS, H, W), out.shape
    # bf16 matmul inputs + bf16 output (f32 accumulation) -> loose tolerance.
    assert jnp.allclose(out.astype(jnp.float32), ref, atol=5e-2, rtol=5e-2), \
        "mismatch vs reference"

    print("KERNEL_OK")
</pallas_src>

<mosaic_0001>
module attributes {stable_mosaic.version = 11 : i64} {
  func.func @_kmeans_conv_kernel(%arg0: i32, %arg1: memref<1x4x512xbf16, #tpu.memory_space<vmem>>, %arg2: memref<9x8x4xbf16, #tpu.memory_space<vmem>>, %arg3: memref<8x1xf32, #tpu.memory_space<vmem>>, %arg4: memref<1x8x384xbf16, #tpu.memory_space<vmem>>) attributes {dimension_semantics = [#tpu.dimension_semantics<parallel>], iteration_bounds = array<i64: 2>, scalar_prefetch = 0 : i64, scratch_operands = 0 : i64, tpu.core_type = #tpu.core_type<tc>, window_params = [{transform_indices = @transform_0, window_bounds = array<i64: 1, 4, 512>}, {pipeline_mode = #tpu.pipeline_mode<synchronous>, transform_indices = @transform_1, window_bounds = array<i64: 9, 8, 4>}, {pipeline_mode = #tpu.pipeline_mode<synchronous>, transform_indices = @transform_2, window_bounds = array<i64: 8, 1>}, {transform_indices = @transform_3, window_bounds = array<i64: 1, 8, 384>}]} {
    %c0 = arith.constant 0 : index
    %c0_0 = arith.constant 0 : index
    %0 = vector.load %arg3[%c0, %c0_0] : memref<8x1xf32, #tpu.memory_space<vmem>>, vector<8x1xf32>
    %c0_1 = arith.constant 0 : index
    %c0_2 = arith.constant 0 : index
    %c0_3 = arith.constant 0 : index
    %1 = vector.load %arg1[%c0_1, %c0_2, %c0_3] : memref<1x4x512xbf16, #tpu.memory_space<vmem>>, vector<1x4x512xbf16>
    %2 = vector.shape_cast %1 : vector<1x4x512xbf16> to vector<4x512xbf16>
    %3 = vector.extract_strided_slice %2 {offsets = [0, 0], sizes = [4, 384], strides = [1, 1]} : vector<4x512xbf16> to vector<4x384xbf16>
    %c0_4 = arith.constant 0 : index
    %c0_5 = arith.constant 0 : index
    %c0_6 = arith.constant 0 : index
    %4 = vector.load %arg2[%c0_4, %c0_5, %c0_6] : memref<9x8x4xbf16, #tpu.memory_space<vmem>>, vector<1x8x4xbf16>
    %5 = vector.shape_cast %4 : vector<1x8x4xbf16> to vector<8x4xbf16>
    %cst = arith.constant dense<0.000000e+00> : vector<8x384xf32>
    %6 = tpu.matmul %5, %3, %cst {dimension_numbers = #tpu.dot_dimension_numbers<[1], [0], [0], [1], [0, 0, 1, 1], [], []>} : vector<8x4xbf16>, vector<4x384xbf16>, vector<8x384xf32> -> vector<8x384xf32>
    %7 = vector.extract_strided_slice %2 {offsets = [0, 1], sizes = [4, 384], strides = [1, 1]} : vector<4x512xbf16> to vector<4x384xbf16>
    %c1 = arith.constant 1 : index
    %c0_7 = arith.constant 0 : index
    %c0_8 = arith.constant 0 : index
    %8 = vector.load %arg2[%c1, %c0_7, %c0_8] : memref<9x8x4xbf16, #tpu.memory_space<vmem>>, vector<1x8x4xbf16>
    %9 = vector.shape_cast %8 : vector<1x8x4xbf16> to vector<8x4xbf16>
    %cst_9 = arith.constant dense<0.000000e+00> : vector<8x384xf32>
    %10 = tpu.matmul %9, %7, %cst_9 {dimension_numbers = #tpu.dot_dimension_numbers<[1], [0], [0], [1], [0, 0, 1, 1], [], []>} : vector<8x4xbf16>, vector<4x384xbf16>, vector<8x384xf32> -> vector<8x384xf32>
    %11 = arith.addf %6, %10 : vector<8x384xf32>
    %12 = vector.extract_strided_slice %2 {offsets = [0, 2], sizes = [4, 384], strides = [1, 1]} : vector<4x512xbf16> to vector<4x384xbf16>
    %c2 = arith.constant 2 : index
    %c0_10 = arith.constant 0 : index
    %c0_11 = arith.constant 0 : index
    %13 = vector.load %arg2[%c2, %c0_10, %c0_11] : memref<9x8x4xbf16, #tpu.memory_space<vmem>>, vector<1x8x4xbf16>
    %14 = vector.shape_cast %13 : vector<1x8x4xbf16> to vector<8x4xbf16>
    %cst_12 = arith.constant dense<0.000000e+00> : vector<8x384xf32>
    %15 = tpu.matmul %14, %12, %cst_12 {dimension_numbers = #tpu.dot_dimension_numbers<[1], [0], [0], [1], [0, 0, 1, 1], [], []>} : vector<8x4xbf16>, vector<4x384xbf16>, vector<8x384xf32> -> vector<8x384xf32>
    %16 = arith.addf %11, %15 : vector<8x384xf32>
    %17 = vector.extract_strided_slice %2 {offsets = [0, 18], sizes = [4, 384], strides = [1, 1]} : vector<4x512xbf16> to vector<4x384xbf16>
    %c3 = arith.constant 3 : index
    %c0_13 = arith.constant 0 : index
    %c0_14 = arith.constant 0 : index
    %18 = vector.load %arg2[%c3, %c0_13, %c0_14] : memref<9x8x4xbf16, #tpu.memory_space<vmem>>, vector<1x8x4xbf16>
    %19 = vector.shape_cast %18 : vector<1x8x4xbf16> to vector<8x4xbf16>
    %cst_15 = arith.constant dense<0.000000e+00> : vector<8x384xf32>
    %20 = tpu.matmul %19, %17, %cst_15 {dimension_numbers = #tpu.dot_dimension_numbers<[1], [0], [0], [1], [0, 0, 1, 1], [], []>} : vector<8x4xbf16>, vector<4x384xbf16>, vector<8x384xf32> -> vector<8x384xf32>
    %21 = arith.addf %16, %20 : vector<8x384xf32>
    %22 = vector.extract_strided_slice %2 {offsets = [0, 19], sizes = [4, 384], strides = [1, 1]} : vector<4x512xbf16> to vector<4x384xbf16>
    %c4 = arith.constant 4 : index
    %c0_16 = arith.constant 0 : index
    %c0_17 = arith.constant 0 : index
    %23 = vector.load %arg2[%c4, %c0_16, %c0_17] : memref<9x8x4xbf16, #tpu.memory_space<vmem>>, vector<1x8x4xbf16>
    %24 = vector.shape_cast %23 : vector<1x8x4xbf16> to vector<8x4xbf16>
    %cst_18 = arith.constant dense<0.000000e+00> : vector<8x384xf32>
    %25 = tpu.matmul %24, %22, %cst_18 {dimension_numbers = #tpu.dot_dimension_numbers<[1], [0], [0], [1], [0, 0, 1, 1], [], []>} : vector<8x4xbf16>, vector<4x384xbf16>, vector<8x384xf32> -> vector<8x384xf32>
    %26 = arith.addf %21, %25 : vector<8x384xf32>
    %27 = vector.extract_strided_slice %2 {offsets = [0, 20], sizes = [4, 384], strides = [1, 1]} : vector<4x512xbf16> to vector<4x384xbf16>
    %c5 = arith.constant 5 : index
    %c0_19 = arith.constant 0 : index
    %c0_20 = arith.constant 0 : index
    %28 = vector.load %arg2[%c5, %c0_19, %c0_20] : memref<9x8x4xbf16, #tpu.memory_space<vmem>>, vector<1x8x4xbf16>
    %29 = vector.shape_cast %28 : vector<1x8x4xbf16> to vector<8x4xbf16>
    %cst_21 = arith.constant dense<0.000000e+00> : vector<8x384xf32>
    %30 = tpu.matmul %29, %27, %cst_21 {dimension_numbers = #tpu.dot_dimension_numbers<[1], [0], [0], [1], [0, 0, 1, 1], [], []>} : vector<8x4xbf16>, vector<4x384xbf16>, vector<8x384xf32> -> vector<8x384xf32>
    %31 = arith.addf %26, %30 : vector<8x384xf32>
    %32 = vector.extract_strided_slice %2 {offsets = [0, 36], sizes = [4, 384], strides = [1, 1]} : vector<4x512xbf16> to vector<4x384xbf16>
    %c6 = arith.constant 6 : index
    %c0_22 = arith.constant 0 : index
    %c0_23 = arith.constant 0 : index
    %33 = vector.load %arg2[%c6, %c0_22, %c0_23] : memref<9x8x4xbf16, #tpu.memory_space<vmem>>, vector<1x8x4xbf16>
    %34 = vector.shape_cast %33 : vector<1x8x4xbf16> to vector<8x4xbf16>
    %cst_24 = arith.constant dense<0.000000e+00> : vector<8x384xf32>
    %35 = tpu.matmul %34, %32, %cst_24 {dimension_numbers = #tpu.dot_dimension_numbers<[1], [0], [0], [1], [0, 0, 1, 1], [], []>} : vector<8x4xbf16>, vector<4x384xbf16>, vector<8x384xf32> -> vector<8x384xf32>
    %36 = arith.addf %31, %35 : vector<8x384xf32>
    %37 = vector.extract_strided_slice %2 {offsets = [0, 37], sizes = [4, 384], strides = [1, 1]} : vector<4x512xbf16> to vector<4x384xbf16>
    %c7 = arith.constant 7 : index
    %c0_25 = arith.constant 0 : index
    %c0_26 = arith.constant 0 : index
    %38 = vector.load %arg2[%c7, %c0_25, %c0_26] : memref<9x8x4xbf16, #tpu.memory_space<vmem>>, vector<1x8x4xbf16>
    %39 = vector.shape_cast %38 : vector<1x8x4xbf16> to vector<8x4xbf16>
    %cst_27 = arith.constant dense<0.000000e+00> : vector<8x384xf32>
    %40 = tpu.matmul %39, %37, %cst_27 {dimension_numbers = #tpu.dot_dimension_numbers<[1], [0], [0], [1], [0, 0, 1, 1], [], []>} : vector<8x4xbf16>, vector<4x384xbf16>, vector<8x384xf32> -> vector<8x384xf32>
    %41 = arith.addf %36, %40 : vector<8x384xf32>
    %42 = vector.extract_strided_slice %2 {offsets = [0, 38], sizes = [4, 384], strides = [1, 1]} : vector<4x512xbf16> to vector<4x384xbf16>
    %c8 = arith.constant 8 : index
    %c0_28 = arith.constant 0 : index
    %c0_29 = arith.constant 0 : index
    %43 = vector.load %arg2[%c8, %c0_28, %c0_29] : memref<9x8x4xbf16, #tpu.memory_space<vmem>>, vector<1x8x4xbf16>
    %44 = vector.shape_cast %43 : vector<1x8x4xbf16> to vector<8x4xbf16>
    %cst_30 = arith.constant dense<0.000000e+00> : vector<8x384xf32>
    %45 = tpu.matmul %44, %42, %cst_30 {dimension_numbers = #tpu.dot_dimension_numbers<[1], [0], [0], [1], [0, 0, 1, 1], [], []>} : vector<8x4xbf16>, vector<4x384xbf16>, vector<8x384xf32> -> vector<8x384xf32>
    %46 = arith.addf %41, %45 : vector<8x384xf32>
    %47 = vector.broadcast %0 : vector<8x1xf32> to vector<8x384xf32>
    %48 = arith.addf %46, %47 : vector<8x384xf32>
    %49 = arith.truncf %48 : vector<8x384xf32> to vector<8x384xbf16>
    %c0_31 = arith.constant 0 : index
    %c0_32 = arith.constant 0 : index
    %c0_33 = arith.constant 0 : index
    %50 = vector.load %arg4[%c0_31, %c0_32, %c0_33] : memref<1x8x384xbf16, #tpu.memory_space<vmem>>, vector<1x8x384xbf16>
    %51 = vector.shape_cast %50 : vector<1x8x384xbf16> to vector<8x384xbf16>
    %52 = vector.shape_cast %49 : vector<8x384xbf16> to vector<1x8x384xbf16>
    tpu.vector_store %arg4[%c0_31, %c0_32, %c0_33], %52 {strides = array<i32>} : memref<1x8x384xbf16, #tpu.memory_space<vmem>>, vector<1x8x384xbf16>,
    return
  }
  func.func @transform_0(%arg0: i32) -> (i32, i32, i32) {
    %c0_i32 = arith.constant 0 : i32
    %c0_i32_0 = arith.constant 0 : i32
    %c0_i32_1 = arith.constant 0 : i32
    return %arg0, %c0_i32, %c0_i32_0 : i32, i32, i32
  }
  func.func @transform_1(%arg0: i32) -> (i32, i32, i32) {
    %c0_i32 = arith.constant 0 : i32
    %c0_i32_0 = arith.constant 0 : i32
    %c0_i32_1 = arith.constant 0 : i32
    %c0_i32_2 = arith.constant 0 : i32
    return %c0_i32, %c0_i32_0, %c0_i32_1 : i32, i32, i32
  }
  func.func @transform_2(%arg0: i32) -> (i32, i32) {
    %c0_i32 = arith.constant 0 : i32
    %c0_i32_0 = arith.constant 0 : i32
    %c0_i32_1 = arith.constant 0 : i32
    return %c0_i32, %c0_i32_0 : i32, i32
  }
  func.func @transform_3(%arg0: i32) -> (i32, i32, i32) {
    %c0_i32 = arith.constant 0 : i32
    %c0_i32_0 = arith.constant 0 : i32
    %c0_i32_1 = arith.constant 0 : i32
    return %arg0, %c0_i32, %c0_i32_0 : i32, i32, i32
  }
}

</mosaic_0001>

<bundles_post_ra>
// kernel: kmeans_conv_forward.1
= control target key start
LH: loop header
LB: loop body
LE: loop exit
PB: predicated region body
PF: predicated region fallthrough
CT: control target
= control target key end

     0   :  { %s1428_s12 = smov 0   ;;  %s1587_s0 = inlined_call_operand.vmem [shape: bf16[2,4,512], index: 0, kind: input, shape index: {}]   ;;  %s1588_s1 = inlined_call_operand.vmem [shape: bf16[9,8,4], index: 1, kind: input, shape index: {}]   ;;  %s1589_s2 = inlined_call_operand.vmem [shape: f32[8,1], index: 2, kind: input, shape index: {}]   ;;  %s1590_s3 = inlined_call_operand.vmem [shape: bf16[2,8,384], index: 3, kind: output, shape index: {}]  }
   0x1 LB: > { %s1243_s13 = sadd.s32 4294967295, %s1394_s12   ;;  %p1247_p0 = scmp.ge.s32.totalorder %s1394_s12, 1  ;;  %s1394_s12 = sphi %s1428_s12, %s13_s12  }
   0x2   : > { %p137_p1 = scmp.lt.s32.totalorder %s1394_s12, 3 }
   0x4   : > { %p138_p2 = pnand %p1247_p0, %p137_p1 }
   0x5   : > { %p161_p3 = scmp.lt.s32.totalorder (!%p138_p2), %s1243_s13, 1  ;;  %s1400_s18 = smov (!%p138_p2), 127  }
   0x6   : > { %141 = sbr.rel (%p138_p2) target bundleno = 410 (0x19a), region = 32  ;;  %s1401_s19 = smov (!%p138_p2), 126  }
   0x7   : > { %s1402_s20 = smov (!%p138_p2), 110   ;;  %s1403_s21 = smov (!%p138_p2), 109  }
   0x8   : > { %s1404_s22 = smov (!%p138_p2), 108   ;;  %s1405_s23 = smov (!%p138_p2), 92  }
   0x9   : > { %s1406_s24 = smov (!%p138_p2), 91   ;;  %s1407_s25 = smov (!%p138_p2), 90  }
   0xb   : > { %v182_v0 = vlaneseq  ;;  %v1396_v1 = vmov 1983009808   ;;  %s1592_s13 = smov (!%p161_p3, %s1243_s13), 1  ;;  %v1397_v5 = vmov 0.0   ;;  %v1398_v6 = vmov 0   ;;  %v172_v14 = vld [vmem:[%s1589_s2] sm:$0xff] }
   0xc   : > { %v180_v2 = vunpack.c.l.s4 %v1396_v1  ;;  %1311 = vmatprep.subr.bf16.mxu1 %v1397_v5  ;;  %253 = vmatprep.mubr.bf16.mxu0 %v1398_v6  ;;  %s1290_s14 = sshll.u32 %s1592_s13, 3  ;;  %vm1399_vm0 = vmmov 0   ;;  %vm203_vm1 = vcmask 1039360   ;;  %vm211_vm2 = vcmask 1041408   ;;  %v1251_v23 = vld [vmem:[%s1588_s1 + $0x4] sm:$0xf] }
   0xd   : > { %v183_v3 = vshrl.u32 %v182_v0, 7  ;;  %1386 = vset.pattern.permute.xlu0 %v1398_v6  ;;  %s165_s17 = scalar_lea.vmem %s1587_s0, %s1290_s14  ;;  %1313 = vmatprep.mubr.msk.bf16.mxu1 %vm1399_vm0, %v1397_v5  ;;  %vm207_vm3 = vcmask 31744   ;;  %vm405_vm4 = vcmask 1031168   ;;  %v174_v34 = vld [vmem:[%s1588_s1] sm:$0xf]  ;;  %vm515_vm5 = vcmask 900096  }
   0xe   : > { %v181_v4 = vunpack.c.0.s8 %v180_v2  ;;  %v173_v8 = vld [vmem:[%s165_s17] sm:$0xff]  ;;  %v1258_v44 = vld [vmem:[%s1588_s1 + $0x8] sm:$0xf]  ;;  %vm625_vm6 = vcmask 891904   ;;  %v1262_v54 = vld [vmem:[%s1588_s1 + $0xc] sm:$0xf] }
   0xf   : > { %v178_v10 = vcombine.high %v173_v8, %v173_v8  ;;  %vm735_vm7 = vcmask 883712   ;;  %v1266_v0 = vld [vmem:[%s1588_s1 + $0x10] sm:$0xf]  ;;  %vm845_vm8 = vcmask 752640   ;;  %vm955_vm9 = vcmask 744448  }
  0x10   : > { %v184_v7 = vsub.s32 %v181_v4, %v183_v3  ;;  %vm1065_vm10 = vcmask 736256  }
  0x12   : > { %v1447_v9 = vrot.slane %v173_v8, %v184_v7  ;;  %v1450_v11 = vrot.slane %v178_v10, %v184_v7 }
  0x14   : > { %195 = vrot.lane.b32.xlu0 %v1447_v9, %s1400_s18  ;;  %v193_v12 = vcombine.high %v1447_v9, %v1447_v9  ;;  %199 = vrot.lane.b32.xlu1 %v1450_v11, %s1400_s18  ;;  %v194_v13 = vcombine.high %v1450_v11, %v1450_v11  ;;  %v306_v26 = vsel %vm211_vm2, %v1447_v9, 0  ;;  %v312_v28 = vsel %vm211_vm2, %v1450_v11, 0 }
  0x18   : > { %197 = vrot.lane.b32.xlu0 %v193_v12, %s1400_s18  ;;  %201 = vrot.lane.b32.xlu1 %v194_v13, %s1400_s18 }
  0x1c   : > { %397 = vrot.lane.b32.xlu0 %v1447_v9, %s1401_s19  ;;  %399 = vrot.lane.b32.xlu1 %v193_v12, %s1401_s19 }
  0x20   : > { %401 = vrot.lane.b32.xlu0 %v1450_v11, %s1401_s19  ;;  %403 = vrot.lane.b32.xlu1 %v194_v13, %s1401_s19 }
  0x24   : > { %507 = vrot.lane.b32.xlu0 %v1447_v9, %s1402_s20  ;;  %509 = vrot.lane.b32.xlu1 %v193_v12, %s1402_s20 }
  0x28   : > { %511 = vrot.lane.b32.xlu0 %v1450_v11, %s1402_s20  ;;  %513 = vrot.lane.b32.xlu1 %v194_v13, %s1402_s20 }
  0x2c   : > { %617 = vrot.lane.b32.xlu0 %v1447_v9, %s1403_s21  ;;  %619 = vrot.lane.b32.xlu1 %v193_v12, %s1403_s21 }
  0x30   : > { %621 = vrot.lane.b32.xlu0 %v1450_v11, %s1403_s21  ;;  %623 = vrot.lane.b32.xlu1 %v194_v13, %s1403_s21  ;;  %s1365_s21 = smul.u32 12, %s1592_s13 }
  0x34   : > { %727 = vrot.lane.b32.xlu0 %v1447_v9, %s1404_s22  ;;  %729 = vrot.lane.b32.xlu1 %v193_v12, %s1404_s22 }
  0x38   : > { %731 = vrot.lane.b32.xlu0 %v1450_v11, %s1404_s22  ;;  %733 = vrot.lane.b32.xlu1 %v194_v13, %s1404_s22 }
  0x3c   : > { %837 = vrot.lane.b32.xlu0 %v1447_v9, %s1405_s23  ;;  %839 = vrot.lane.b32.xlu1 %v193_v12, %s1405_s23 }
  0x40   : > { %841 = vrot.lane.b32.xlu0 %v1450_v11, %s1405_s23  ;;  %843 = vrot.lane.b32.xlu1 %v194_v13, %s1405_s23 }
  0x44   : > { %947 = vrot.lane.b32.xlu0 %v1447_v9, %s1406_s24  ;;  %949 = vrot.lane.b32.xlu1 %v193_v12, %s1406_s24 }
  0x48   : > { %951 = vrot.lane.b32.xlu0 %v1450_v11, %s1406_s24  ;;  %953 = vrot.lane.b32.xlu1 %v194_v13, %s1406_s24  ;;  %s170_s24 = scalar_lea.vmem %s1590_s3, %s1365_s21 }
  0x4c   : > { %1057 = vrot.lane.b32.xlu0 %v1447_v9, %s1407_s25  ;;  %1059 = vrot.lane.b32.xlu1 %v193_v12, %s1407_s25 }
  0x50   : > { %1061 = vrot.lane.b32.xlu0 %v1450_v11, %s1407_s25  ;;  %1063 = vrot.lane.b32.xlu1 %v194_v13, %s1407_s25 }
  0x54   : > { %1167 = vperm.xlu0 %1386, %v172_v14  }
  0x86   : > { %v196_v15 = vpop.permute.xlu0 %195  ;;  %v200_v16 = vpop.permute.xlu1 %199 }
  0x8a   : > { %v198_v17 = vpop.permute.xlu0 %197  ;;  %v202_v20 = vpop.permute.xlu1 %201 }
  0x8b   : > { %v205_v18 = vsel %vm203_vm1, %v198_v17, %v200_v16  ;;  %v204_v19 = vsel %vm203_vm1, %v196_v15, %v198_v17  ;;  %v206_v22 = vsel %vm203_vm1, %v200_v16, %v202_v20 }
  0x8c   : > { %1252 = vmatprep.subr.msk.bf16.mxu0 %vm211_vm2, %v205_v18  ;;  %v213_v21 = vsel %vm211_vm2, %v204_v19, 0  ;;  %v219_v24 = vsel %vm211_vm2, %v206_v22, 0  ;;  %v1274_v22 = vld [vmem:[%s1588_s1 + $0x18] sm:$0xf] }
  0x8d   : > { %236 = vmatpush1.bf16.msra.mxu0 %v213_v21  ;;  %1312 = vmatpush3.bf16.msra.mxu1 %v219_v24 }
  0x8e   : > { %v398_v25 = vpop.permute.xlu0 %397  ;;  %1255 = vmatprep.subr.msk.bf16.mxu0 %vm211_vm2, %v193_v12  ;;  %1317 = vmatprep.subr.bf16.mxu1 %v1397_v5  ;;  %v400_v27 = vpop.permute.xlu1 %399  ;;  %v1270_v12 = vld [vmem:[%s1588_s1 + $0x14] sm:$0xf] }
  0x8f   : > { %v406_v30 = vsel %vm405_vm4, %v398_v25, %v400_v27 }
  0x90   : > { %1253 = vmatmul.mubr.msk.bf16.vlgmr.msra.gmra.mxu0 %vm207_vm3, %v1251_v23  ;;  %1314 = vmatmul.mubr.msk.bf16.vlgmr.msra.gmra.mxu1 %vm207_vm3, %v1251_v23  ;;  %v413_v35 = vsel %vm211_vm2, %v406_v30, 0 }
  0x91   : > { %329 = vmatpush1.bf16.msra.mxu0 %v306_v26  ;;  %346 = vmatprep.mubr.bf16.mxu0 %v1398_v6 }
  0x92   : > { %v402_v29 = vpop.permute.xlu0 %401  ;;  %1318 = vmatpush3.bf16.msra.mxu1 %v312_v28  ;;  %1319 = vmatprep.mubr.msk.bf16.mxu1 %vm1399_vm0, %v1397_v5  ;;  %v404_v32 = vpop.permute.xlu1 %403 }
  0x93   : > { %v407_v31 = vsel %vm405_vm4, %v400_v27, %v402_v29  ;;  %1323 = vmatprep.subr.bf16.mxu1 %v1397_v5  ;;  %v408_v33 = vsel %vm405_vm4, %v402_v29, %v404_v32  ;;  %v1278_v32 = vld [vmem:[%s1588_s1 + $0x1c] sm:$0xf] }
  0x94   : > { %1259 = vmatprep.subr.msk.bf16.mxu0 %vm211_vm2, %v407_v31  ;;  %v419_v37 = vsel %vm211_vm2, %v408_v33, 0 }
  0x96   : > { %v508_v36 = vpop.permute.xlu0 %507  ;;  %v510_v38 = vpop.permute.xlu1 %509 }
  0x97   : > { %v516_v40 = vsel %vm515_vm5, %v508_v36, %v510_v38 }
  0x98   : > { %1256 = vmatmul.mubr.msk.bf16.vlgmr.msra.gmra.mxu0 %vm207_vm3, %v174_v34  ;;  %1320 = vmatmul.mubr.msk.bf16.vlgmr.msra.gmra.mxu1 %vm207_vm3, %v174_v34  ;;  %v523_v45 = vsel %vm211_vm2, %v516_v40, 0 }
  0x99   : > { %436 = vmatpush1.bf16.msra.mxu0 %v413_v35  ;;  %453 = vmatprep.mubr.bf16.mxu0 %v1398_v6  ;;  %v1282_v35 = vld [vmem:[%s1588_s1 + $0x20] sm:$0xf] }
  0x9a   : > { %v512_v39 = vpop.permute.xlu0 %511  ;;  %1324 = vmatpush3.bf16.msra.mxu1 %v419_v37  ;;  %1325 = vmatprep.mubr.msk.bf16.mxu1 %vm1399_vm0, %v1397_v5  ;;  %v514_v42 = vpop.permute.xlu1 %513 }
  0x9b   : > { %v517_v41 = vsel %vm515_vm5, %v510_v38, %v512_v39  ;;  %1329 = vmatprep.subr.bf16.mxu1 %v1397_v5  ;;  %v518_v43 = vsel %vm515_vm5, %v512_v39, %v514_v42 }
  0x9c   : > { %1263 = vmatprep.subr.msk.bf16.mxu0 %vm211_vm2, %v517_v41  ;;  %v529_v47 = vsel %vm211_vm2, %v518_v43, 0 }
  0x9e   : > { %v618_v46 = vpop.permute.xlu0 %617  ;;  %v620_v48 = vpop.permute.xlu1 %619 }
  0x9f   : > { %v626_v50 = vsel %vm625_vm6, %v618_v46, %v620_v48 }
  0xa0   : > { %1260 = vmatmul.mubr.msk.bf16.vlgmr.msra.gmra.mxu0 %vm207_vm3, %v1258_v44  ;;  %1326 = vmatmul.mubr.msk.bf16.vlgmr.msra.gmra.mxu1 %vm207_vm3, %v1258_v44  ;;  %v633_v55 = vsel %vm211_vm2, %v626_v50, 0 }
  0xa1   : > { %546 = vmatpush1.bf16.msra.mxu0 %v523_v45  ;;  %563 = vmatprep.mubr.bf16.mxu0 %v1398_v6 }
  0xa2   : > { %v622_v49 = vpop.permute.xlu0 %621  ;;  %1330 = vmatpush3.bf16.msra.mxu1 %v529_v47  ;;  %1331 = vmatprep.mubr.msk.bf16.mxu1 %vm1399_vm0, %v1397_v5  ;;  %v624_v52 = vpop.permute.xlu1 %623 }
  0xa3   : > { %v627_v51 = vsel %vm625_vm6, %v620_v48, %v622_v49  ;;  %1335 = vmatprep.subr.bf16.mxu1 %v1397_v5  ;;  %v628_v53 = vsel %vm625_vm6, %v622_v49, %v624_v52 }
  0xa4   : > { %1267 = vmatprep.subr.msk.bf16.mxu0 %vm211_vm2, %v627_v51  ;;  %v639_v57 = vsel %vm211_vm2, %v628_v53, 0 }
  0xa6   : > { %v728_v56 = vpop.permute.xlu0 %727  ;;  %v730_v58 = vpop.permute.xlu1 %729 }
  0xa7   : > { %v736_v60 = vsel %vm735_vm7, %v728_v56, %v730_v58 }
  0xa8   : > { %1264 = vmatmul.mubr.msk.bf16.vlgmr.msra.gmra.mxu0 %vm207_vm3, %v1262_v54  ;;  %1332 = vmatmul.mubr.msk.bf16.vlgmr.msra.gmra.mxu1 %vm207_vm3, %v1262_v54  ;;  %v743_v1 = vsel %vm211_vm2, %v736_v60, 0 }
  0xa9   : > { %656 = vmatpush1.bf16.msra.mxu0 %v633_v55  ;;  %673 = vmatprep.mubr.bf16.mxu0 %v1398_v6 }
  0xaa   : > { %v732_v59 = vpop.permute.xlu0 %731  ;;  %1336 = vmatpush3.bf16.msra.mxu1 %v639_v57  ;;  %1337 = vmatprep.mubr.msk.bf16.mxu1 %vm1399_vm0, %v1397_v5  ;;  %v734_v62 = vpop.permute.xlu1 %733 }
  0xab   : > { %v737_v61 = vsel %vm735_vm7, %v730_v58, %v732_v59  ;;  %1341 = vmatprep.subr.bf16.mxu1 %v1397_v5  ;;  %v738_v63 = vsel %vm735_vm7, %v732_v59, %v734_v62 }
  0xac   : > { %1271 = vmatprep.subr.msk.bf16.mxu0 %vm211_vm2, %v737_v61  ;;  %v749_v3 = vsel %vm211_vm2, %v738_v63, 0 }
  0xae   : > { %v838_v2 = vpop.permute.xlu0 %837  ;;  %v840_v4 = vpop.permute.xlu1 %839 }
  0xaf   : > { %v846_v8 = vsel %vm845_vm8, %v838_v2, %v840_v4 }
  0xb0   : > { %1268 = vmatmul.mubr.msk.bf16.vlgmr.msra.gmra.mxu0 %vm207_vm3, %v1266_v0  ;;  %1338 = vmatmul.mubr.msk.bf16.vlgmr.msra.gmra.mxu1 %vm207_vm3, %v1266_v0  ;;  %v853_v13 = vsel %vm211_vm2, %v846_v8, 0 }
  0xb1   : > { %766 = vmatpush1.bf16.msra.mxu0 %v743_v1  ;;  %783 = vmatprep.mubr.bf16.mxu0 %v1398_v6 }
  0xb2   : > { %v842_v7 = vpop.permute.xlu0 %841  ;;  %1342 = vmatpush3.bf16.msra.mxu1 %v749_v3  ;;  %1343 = vmatprep.mubr.msk.bf16.mxu1 %vm1399_vm0, %v1397_v5  ;;  %v844_v10 = vpop.permute.xlu1 %843 }
  0xb3   : > { %v847_v9 = vsel %vm845_vm8, %v840_v4, %v842_v7  ;;  %1347 = vmatprep.subr.bf16.mxu1 %v1397_v5  ;;  %v848_v11 = vsel %vm845_vm8, %v842_v7, %v844_v10 }
  0xb4   : > { %1275 = vmatprep.subr.msk.bf16.mxu0 %vm211_vm2, %v847_v9  ;;  %v859_v15 = vsel %vm211_vm2, %v848_v11, 0 }
  0xb6   : > { %v948_v14 = vpop.permute.xlu0 %947  ;;  %v950_v16 = vpop.permute.xlu1 %949 }
  0xb7   : > { %v956_v18 = vsel %vm955_vm9, %v948_v14, %v950_v16 }
  0xb8   : > { %1272 = vmatmul.mubr.msk.bf16.vlgmr.msra.gmra.mxu0 %vm207_vm3, %v1270_v12  ;;  %1344 = vmatmul.mubr.msk.bf16.vlgmr.msra.gmra.mxu1 %vm207_vm3, %v1270_v12  ;;  %v963_v23 = vsel %vm211_vm2, %v956_v18, 0 }
  0xb9   : > { %876 = vmatpush1.bf16.msra.mxu0 %v853_v13  ;;  %893 = vmatprep.mubr.bf16.mxu0 %v1398_v6 }
  0xba   : > { %v952_v17 = vpop.permute.xlu0 %951  ;;  %1348 = vmatpush3.bf16.msra.mxu1 %v859_v15  ;;  %1349 = vmatprep.mubr.msk.bf16.mxu1 %vm1399_vm0, %v1397_v5  ;;  %v954_v20 = vpop.permute.xlu1 %953 }
  0xbb   : > { %v957_v19 = vsel %vm955_vm9, %v950_v16, %v952_v17  ;;  %1353 = vmatprep.subr.bf16.mxu1 %v1397_v5  ;;  %v958_v21 = vsel %vm955_vm9, %v952_v17, %v954_v20 }
  0xbc   : > { %1279 = vmatprep.subr.msk.bf16.mxu0 %vm211_vm2, %v957_v19  ;;  %v969_v25 = vsel %vm211_vm2, %v958_v21, 0 }
  0xbe   : > { %v1058_v24 = vpop.permute.xlu0 %1057  ;;  %v1060_v26 = vpop.permute.xlu1 %1059 }
  0xbf   : > { %v1066_v28 = vsel %vm1065_vm10, %v1058_v24, %v1060_v26 }
  0xc0   : > { %1276 = vmatmul.mubr.msk.bf16.vlgmr.msra.gmra.mxu0 %vm207_vm3, %v1274_v22  ;;  %1350 = vmatmul.mubr.msk.bf16.vlgmr.msra.gmra.mxu1 %vm207_vm3, %v1274_v22  ;;  %v1073_v33 = vsel %vm211_vm2, %v1066_v28, 0 }
  0xc1   : > { %986 = vmatpush1.bf16.msra.mxu0 %v963_v23  ;;  %1003 = vmatprep.mubr.bf16.mxu0 %v1398_v6 }
  0xc2   : > { %v1062_v27 = vpop.permute.xlu0 %1061  ;;  %1354 = vmatpush3.bf16.msra.mxu1 %v969_v25  ;;  %1355 = vmatprep.mubr.msk.bf16.mxu1 %vm1399_vm0, %v1397_v5  ;;  %v1064_v30 = vpop.permute.xlu1 %1063 }
  0xc3   : > { %v1067_v29 = vsel %vm1065_vm10, %v1060_v26, %v1062_v27  ;;  %1359 = vmatprep.subr.bf16.mxu1 %v1397_v5  ;;  %v1068_v31 = vsel %vm1065_vm10, %v1062_v27, %v1064_v30 }
  0xc4   : > { %1283 = vmatprep.subr.msk.bf16.mxu0 %vm211_vm2, %v1067_v29  ;;  %v1079_v34 = vsel %vm211_vm2, %v1068_v31, 0 }
  0xc8   : > { %1280 = vmatmul.mubr.msk.bf16.vlgmr.msra.gmra.mxu0 %vm207_vm3, %v1278_v32  ;;  %1356 = vmatmul.mubr.msk.bf16.vlgmr.msra.gmra.mxu1 %vm207_vm3, %v1278_v32 }
  0xc9   : > { %1096 = vmatpush1.bf16.msra.mxu0 %v1073_v33  ;;  %1113 = vmatprep.mubr.bf16.mxu0 %v1398_v6 }
  0xca   : > { %1360 = vmatpush3.bf16.msra.mxu1 %v1079_v34  ;;  %1361 = vmatprep.mubr.msk.bf16.mxu1 %vm1399_vm0, %v1397_v5 }
  0xd0   : > { %1284 = vmatmul.mubr.msk.bf16.vlgmr.msra.gmra.mxu0 %vm207_vm3, %v1282_v35  ;;  %1362 = vmatmul.mubr.msk.bf16.vlgmr.msra.gmra.mxu1 %vm207_vm3, %v1282_v35 }
 0x150   : > { %v255_v36 = vpop.f32.mrf.mxu0  ;;  %v296_v38 = vpop.f32.mrf.mxu1 }
 0x152   : > { %v257_v37 = vpop.f32.mrf.mxu0  ;;  %v1315_v40 = vpop.f32.mrf.mxu1 }
 0x154   : > { %v259_v39 = vpop.f32.mrf.mxu0  ;;  %v299_v41 = vpop.f32.mrf.mxu1 }
 0x156   : > { %v260_v6 = vpop.f32.mrf.mxu0  ;;  %v1316_v42 = vpop.f32.mrf.mxu1 }
 0x158   : > { %v348_v43 = vpop.f32.mrf.mxu0  ;;  %v389_v45 = vpop.f32.mrf.mxu1 }
 0x159   : > { %v349_v23 = vadd.f32 %v348_v43, %v255_v36  ;;  %v390_v27 = vadd.f32 %v389_v45, %v296_v38 }
 0x15a   : > { %v350_v44 = vpop.f32.mrf.mxu0  ;;  %v1321_v46 = vpop.f32.mrf.mxu1 }
 0x15b   : > { %v351_v26 = vadd.f32 %v350_v44, %v257_v37 }
 0x15c   : > { %v352_v5 = vpop.f32.mrf.mxu0  ;;  %v392_v48 = vpop.f32.mrf.mxu1 }
 0x15e   : > { %v353_v47 = vpop.f32.mrf.mxu0  ;;  %v1322_v49 = vpop.f32.mrf.mxu1 }
 0x160   : > { %v455_v50 = vpop.f32.mrf.mxu0  ;;  %v496_v52 = vpop.f32.mrf.mxu1 }
 0x161   : > { %v502_v28 = vadd.f32 %v455_v50, %v349_v23  ;;  %v504_v32 = vadd.f32 %v496_v52, %v390_v27 }
 0x162   : > { %v457_v51 = vpop.f32.mrf.mxu0  ;;  %v1327_v54 = vpop.f32.mrf.mxu1 }
 0x163   : > { %v503_v31 = vadd.f32 %v457_v51, %v351_v26 }
 0x164   : > { %v459_v53 = vpop.f32.mrf.mxu0  ;;  %v499_v56 = vpop.f32.mrf.mxu1 }
 0x166   : > { %v460_v55 = vpop.f32.mrf.mxu0  ;;  %v1328_v57 = vpop.f32.mrf.mxu1 }
 0x167   : > { %v1168_v57 = vpop.permute.xlu0 %1167 }
 0x168   : > { %v565_v58 = vpop.f32.mrf.mxu0  ;;  %v606_v60 = vpop.f32.mrf.mxu1 }
 0x169   : > { %v612_v33 = vadd.f32 %v565_v58, %v502_v28  ;;  %v614_v40 = vadd.f32 %v606_v60, %v504_v32 }
 0x16a   : > { %v567_v59 = vpop.f32.mrf.mxu0  ;;  %v1333_v62 = vpop.f32.mrf.mxu1 }
 0x16b   : > { %v613_v39 = vadd.f32 %v567_v59, %v503_v31 }
 0x16c   : > { %v569_v61 = vpop.f32.mrf.mxu0  ;;  %v609_v0 = vpop.f32.mrf.mxu1 }
 0x16e   : > { %v570_v63 = vpop.f32.mrf.mxu0  ;;  %v1334_v1 = vpop.f32.mrf.mxu1 }
 0x170   : > { %v675_v2 = vpop.f32.mrf.mxu0  ;;  %v716_v4 = vpop.f32.mrf.mxu1 }
 0x171   : > { %v722_v6 = vadd.f32 %v675_v2, %v612_v33  ;;  %v724_v46 = vadd.f32 %v716_v4, %v614_v40 }
 0x172   : > { %v677_v3 = vpop.f32.mrf.mxu0  ;;  %v1339_v8 = vpop.f32.mrf.mxu1 }
 0x173   : > { %v723_v5 = vadd.f32 %v677_v3, %v613_v39 }
 0x174   : > { %v679_v7 = vpop.f32.mrf.mxu0  ;;  %v719_v10 = vpop.f32.mrf.mxu1 }
 0x176   : > { %v680_v9 = vpop.f32.mrf.mxu0  ;;  %v1340_v11 = vpop.f32.mrf.mxu1 }
 0x178   : > { %v785_v12 = vpop.f32.mrf.mxu0  ;;  %v826_v14 = vpop.f32.mrf.mxu1 }
 0x179   : > { %v832_v36 = vadd.f32 %v785_v12, %v722_v6  ;;  %v834_v38 = vadd.f32 %v826_v14, %v724_v46 }
 0x17a   : > { %v787_v13 = vpop.f32.mrf.mxu0  ;;  %v1345_v16 = vpop.f32.mrf.mxu1 }
 0x17b   : > { %v833_v37 = vadd.f32 %v787_v13, %v723_v5 }
 0x17c   : > { %v789_v15 = vpop.f32.mrf.mxu0  ;;  %v829_v18 = vpop.f32.mrf.mxu1 }
 0x17e   : > { %v790_v17 = vpop.f32.mrf.mxu0  ;;  %v1346_v19 = vpop.f32.mrf.mxu1 }
 0x180   : > { %v895_v20 = vpop.f32.mrf.mxu0  ;;  %v936_v22 = vpop.f32.mrf.mxu1 }
 0x181   : > { %v942_v44 = vadd.f32 %v895_v20, %v832_v36  ;;  %v944_v50 = vadd.f32 %v936_v22, %v834_v38 }
 0x182   : > { %v897_v21 = vpop.f32.mrf.mxu0  ;;  %v1351_v25 = vpop.f32.mrf.mxu1 }
 0x183   : > { %v943_v49 = vadd.f32 %v897_v21, %v833_v37 }
 0x184   : > { %v899_v24 = vpop.f32.mrf.mxu0  ;;  %v939_v30 = vpop.f32.mrf.mxu1 }
 0x186   : > { %v900_v29 = vpop.f32.mrf.mxu0  ;;  %v1352_v34 = vpop.f32.mrf.mxu1 }
 0x188   : > { %v1005_v35 = vpop.f32.mrf.mxu0  ;;  %v1046_v42 = vpop.f32.mrf.mxu1 }
 0x189   : > { %v1052_v51 = vadd.f32 %v1005_v35, %v942_v44  ;;  %v1054_v55 = vadd.f32 %v1046_v42, %v944_v50 }
 0x18a   : > { %v1007_v41 = vpop.f32.mrf.mxu0  ;;  %v1357_v47 = vpop.f32.mrf.mxu1 }
 0x18b   : > { %v1053_v54 = vadd.f32 %v1007_v41, %v943_v49 }
 0x18c   : > { %v1009_v43 = vpop.f32.mrf.mxu0  ;;  %v1049_v48 = vpop.f32.mrf.mxu1 }
 0x18e   : > { %v1010_v45 = vpop.f32.mrf.mxu0  ;;  %v1358_v52 = vpop.f32.mrf.mxu1 }
 0x190   : > { %v1115_v53 = vpop.f32.mrf.mxu0  ;;  %v1156_v59 = vpop.f32.mrf.mxu1 }
 0x191   : > { %v1162_v56 = vadd.f32 %v1115_v53, %v1052_v51  ;;  %v1164_v61 = vadd.f32 %v1156_v59, %v1054_v55 }
 0x192   : > { %v1117_v58 = vpop.f32.mrf.mxu0  ;;  %v1363_v63 = vpop.f32.mrf.mxu1 }
 0x193   : > { %v1163_v60 = vadd.f32 %v1117_v58, %v1053_v54  ;;  %v1170_v0 = vadd.f32 %v1168_v57, %v1162_v56  ;;  %v1172_v2 = vadd.f32 %v1168_v57, %v1164_v61 }
 0x194   : > { %v1119_v62 = vpop.f32.mrf.mxu0  ;;  %v1159_v4 = vpop.f32.mrf.mxu1 }
 0x195   : > { %v1171_v1 = vadd.f32 %v1168_v57, %v1163_v60  ;;  %v1292_v8 = vpack.c.bf16 %v1172_v2, %v1172_v2 }
 0x196   : > { %v1120_v3 = vpop.f32.mrf.mxu0  ;;  %v1364_v9 = vpop.f32.mrf.mxu1 }
 0x197   : > { %v1291_v7 = vpack.c.bf16 %v1171_v1, %v1170_v0  ;;  %1187 = vst [vmem:[%s170_s24 + $0x8] sm:$0xf] %v1292_v8 }
 0x199   : > { %1186 = vst [vmem:[%s170_s24] sm:$0xff] %v1291_v7 }
 0x19a PF: > { %s13_s12 = sadd.s32 1, %s1394_s12  }
 0x19b   : > { %p10_p4 = scmp.ge.s32.totalorder %s13_s12, 4  }
 0x19d   :  { %12 = sbr.rel (!%p10_p4) target bundleno = 1 (0x1), region = 70 }

</bundles_post_ra>
